<compile_context>
chip_gen: v7x
topology: tpu7x:2x2x1
jax: 0.10.0
libtpu: 0.0.40
codegen_flags: <defaults>
</compile_context>

<pallas_src>
import jax
import jax.numpy as jnp
from jax import lax
from jax.experimental import pallas as pl
from jax.experimental.pallas import tpu as pltpu


# ---------------------------------------------------------------------------
# Fused kernel: one batch element per grid step.
# ---------------------------------------------------------------------------
def _decoder_kernel(x1_ref, x2_ref, m_ref, a_ref, b_ref, bup_ref, bc_ref, o_ref):
    # x1_ref : (1, H, W*Cin)        bf16   input image, lane-packed rows
    # x2_ref : (1, 2, H, Wo*Cskip)  bf16   skip connection, split by row parity
    # m_ref  : (2, W*Cin, Wo*Cout)  bf16   deconv folded into 2 matmul matrices
    # a_ref  : (3, Wo*Cout, Wo*Cout)bf16   conv "up" part, one matrix per kh
    # b_ref  : (3, Wo*Cskip,Wo*Cout)bf16   conv "skip" part, one matrix per kh
    # bup_ref: (1, Wo*Cout) f32            deconv bias, tiled per column
    # bc_ref : (1, Wo*Cout) f32            conv bias, tiled per column
    # o_ref  : (1, H, 2*Wo*Cout) f32       [0:L) even output rows, [L:2L) odd
    f32 = jnp.float32
    H = x1_ref.shape[1]
    L = o_ref.shape[2] // 2

    x1 = x1_ref[0]                    # (H, W*Cin)
    x2e = x2_ref[0, 0]                # (H, Wo*Cskip)  even rows of x2
    x2o = x2_ref[0, 1]                # (H, Wo*Cskip)  odd rows of x2

    # ---- ConvTranspose2d(k=2, s=2): one matmul per output-row parity -------
    bup = bup_ref[...]                                                   # (1, L)
    up0 = jnp.dot(x1, m_ref[0], preferred_element_type=f32) + bup        # rows 2a
    up1 = jnp.dot(x1, m_ref[1], preferred_element_type=f32) + bup        # rows 2a+1

    # ---- +/-1 row shifts with zero fill (the conv's row zero-padding) ------
    # done as tiny shift-matrix matmuls: unambiguous, zero-fill for free,
    # no sublane re-slices / relayouts.
    r = lax.broadcasted_iota(jnp.int32, (H, H), 0)
    c = lax.broadcasted_iota(jnp.int32, (H, H), 1)
    s_prev = (c == r - 1).astype(f32)     # (s_prev @ y)[a] = y[a-1], 0 at a=0
    s_next = (c == r + 1).astype(f32)     # (s_next @ y)[a] = y[a+1], 0 at a=H-1

    up1m = jnp.dot(s_prev, up1, preferred_element_type=f32)
    up0p = jnp.dot(s_next, up0, preferred_element_type=f32)
    x2om = jnp.dot(s_prev, x2o, preferred_element_type=f32)
    x2ep = jnp.dot(s_next, x2e, preferred_element_type=f32)

    bc = bc_ref[...]                                                      # (1, L)

    # ---- 3x3 conv + ReLU.  Channel concat == sum of the two channel groups;
    # column taps + column padding live inside A/B; kh = 0,1,2 are row taps.
    ev = (jnp.dot(up1m, a_ref[0], preferred_element_type=f32)
          + jnp.dot(up0, a_ref[1], preferred_element_type=f32)
          + jnp.dot(up1, a_ref[2], preferred_element_type=f32)
          + jnp.dot(x2om, b_ref[0], preferred_element_type=f32)
          + jnp.dot(x2e, b_ref[1], preferred_element_type=f32)
          + jnp.dot(x2o, b_ref[2], preferred_element_type=f32)
          + bc)
    od = (jnp.dot(up0, a_ref[0], preferred_element_type=f32)
          + jnp.dot(up1, a_ref[1], preferred_element_type=f32)
          + jnp.dot(up0p, a_ref[2], preferred_element_type=f32)
          + jnp.dot(x2e, b_ref[0], preferred_element_type=f32)
          + jnp.dot(x2o, b_ref[1], preferred_element_type=f32)
          + jnp.dot(x2ep, b_ref[2], preferred_element_type=f32)
          + bc)

    # Lane-dense (256-wide, 128-aligned) stores: even rows then odd rows.
    o_ref[0, :, :L] = jnp.maximum(ev, 0.0)
    o_ref[0, :, L:] = jnp.maximum(od, 0.0)


# ---------------------------------------------------------------------------
# Wrapper-side weight folding (tiny, runs once per call under jit).
# ---------------------------------------------------------------------------
def _pack_weights(up_w, up_b, conv_w, conv_b, W):
    # up_w:  (Cin, Cout, 2, 2)   up_b:  (Cout,)
    # conv_w:(Cout, Cmid, 3, 3)  conv_b:(Cout,)
    f32 = jnp.float32
    Cin, Cout = up_w.shape[0], up_w.shape[1]
    Cmid = conv_w.shape[1]
    Cskip = Cmid - Cout
    Wo = 2 * W
    L = Wo * Cout

    # Deconv as matmul: M[di][j*Cin+ci, (2j+dj)*Cout+m] = up_w[ci, m, di, dj]
    eye_w = jnp.eye(W, dtype=f32)
    m_mat = jnp.einsum("ab,cmij->iacbjm", eye_w, up_w.astype(f32))
    m_mat = m_mat.reshape(2, W * Cin, L)

    # 3x3 conv: fold column taps (kw) and column zero-padding into
    # block-tridiagonal matrices, split by channel group (up / skip).
    w_up = conv_w[:, :Cout].astype(f32)      # (Cout, Cout, 3, 3)  [o, m, kh, kw]
    w_sk = conv_w[:, Cout:].astype(f32)      # (Cout, Cskip, 3, 3) [o, c, kh, kw]
    a_list, b_list = [], []
    for kh in range(3):
        a_kh = jnp.zeros((L, L), f32)
        b_kh = jnp.zeros((Wo * Cskip, L), f32)
        for kw in range(3):
            d = jnp.eye(Wo, k=1 - kw, dtype=f32)   # D[q, v] = 1 iff q == v + kw - 1
            a_kh = a_kh + jnp.einsum(
                "qv,mo->qmvo", d, w_up[:, :, kh, kw].T).reshape(L, L)
            b_kh = b_kh + jnp.einsum(
                "qv,co->qcvo", d, w_sk[:, :, kh, kw].T).reshape(Wo * Cskip, L)
        a_list.append(a_kh)
        b_list.append(b_kh)
    a_mat = jnp.stack(a_list)                # (3, L, L)
    b_mat = jnp.stack(b_list)                # (3, Wo*Cskip, L)

    bup_row = jnp.tile(up_b.astype(f32), Wo)[None, :]   # (1, L)
    bc_row = jnp.tile(conv_b.astype(f32), Wo)[None, :]  # (1, L)
    return m_mat, a_mat, b_mat, bup_row, bc_row


# ---------------------------------------------------------------------------
# Decoder.forward: NCHW in / NCHW out (PyTorch semantics).
# ---------------------------------------------------------------------------
def decoder_forward(x1, x2, params):
    up_w, up_b = params["up_w"], params["up_b"]
    conv_w, conv_b = params["conv_w"], params["conv_b"]

    N, Cin, H, W = x1.shape
    Cout = up_w.shape[1]
    Cmid = conv_w.shape[1]
    Cskip = Cmid - Cout
    Ho, Wo = 2 * H, 2 * W
    L = Wo * Cout

    # Lane-packed activations: (rows, W*C) on lanes, bf16 (f32 accumulation
    # happens in-kernel).  These transposes replace the old NCHW->NHWC glue;
    # there are no other HBM intermediates.
    x1m = jnp.transpose(x1, (0, 2, 3, 1)).reshape(N, H, W * Cin)
    x1m = x1m.astype(jnp.bfloat16)
    x2p = jnp.transpose(x2, (0, 2, 3, 1)).reshape(N, H, 2, Wo, Cskip)
    x2p = jnp.transpose(x2p, (0, 2, 1, 3, 4)).reshape(N, 2, H, Wo * Cskip)
    x2p = x2p.astype(jnp.bfloat16)

    m_mat, a_mat, b_mat, bup_row, bc_row = _pack_weights(up_w, up_b, conv_w, conv_b, W)
    m_mat = m_mat.astype(jnp.bfloat16)
    a_mat = a_mat.astype(jnp.bfloat16)
    b_mat = b_mat.astype(jnp.bfloat16)

    out = pl.pallas_call(
        _decoder_kernel,
        grid=(N,),
        in_specs=[
            pl.BlockSpec((1, H, W * Cin), lambda n: (n, 0, 0)),
            pl.BlockSpec((1, 2, H, Wo * Cskip), lambda n: (n, 0, 0, 0)),
            pl.BlockSpec((2, W * Cin, L), lambda n: (0, 0, 0)),
            pl.BlockSpec((3, L, L), lambda n: (0, 0, 0)),
            pl.BlockSpec((3, Wo * Cskip, L), lambda n: (0, 0, 0)),
            pl.BlockSpec((1, L), lambda n: (0, 0)),
            pl.BlockSpec((1, L), lambda n: (0, 0)),
        ],
        out_specs=pl.BlockSpec((1, H, 2 * L), lambda n: (n, 0, 0)),
        out_shape=jax.ShapeDtypeStruct((N, H, 2 * L), jnp.float32),
        compiler_params=pltpu.CompilerParams(
            dimension_semantics=("parallel",),
            vmem_limit_bytes=32 * 1024 * 1024,
        ),
    )(x1m, x2p, m_mat, a_mat, b_mat, bup_row, bc_row)

    # (N, H, 2, Wo, Cout) -> (N, Ho, Wo, Cout): pure row-major metadata
    # reshapes (no relayout), then one transpose back to NCHW.
    out = out.reshape(N, H, 2, Wo, Cout).reshape(N, Ho, Wo, Cout)
    return jnp.transpose(out, (0, 3, 1, 2))


# ---------------------------------------------------------------------------
# Pure-JAX f32 reference (different code path) used as a sanity check.
# ---------------------------------------------------------------------------
def decoder_reference(x1, x2, params):
    up_w, up_b = params["up_w"], params["up_b"]
    conv_w, conv_b = params["conv_w"], params["conv_b"]
    N, Cin, H, W = x1.shape
    Cout = up_w.shape[1]

    x1_nhwc = jnp.transpose(x1, (0, 2, 3, 1))
    up = jnp.einsum("nhwc,coij->nhiwjo", x1_nhwc, up_w)
    up = up.reshape(N, 2 * H, 2 * W, Cout) + up_b[None, None, None, :]

    x2_nhwc = jnp.transpose(x2, (0, 2, 3, 1))
    cat = jnp.concatenate([up, x2_nhwc], axis=-1)
    Ho, Wo = 2 * H, 2 * W
    cat_pad = jnp.pad(cat, ((0, 0), (1, 1), (1, 1), (0, 0)))
    wc_t = jnp.transpose(conv_w, (2, 3, 1, 0))
    acc = jnp.zeros((N, Ho, Wo, Cout), jnp.float32)
    for kh in range(3):
        for kw in range(3):
            acc = acc + jnp.einsum("nhwc,co->nhwo",
                                   cat_pad[:, kh:kh + Ho, kw:kw + Wo, :],
                                   wc_t[kh, kw])
    out = jnp.maximum(acc + conv_b[None, None, None, :], 0.0)
    return jnp.transpose(out, (0, 3, 1, 2))


if __name__ == "__main__":
    # Decoder(in_channels=8, middle_channels=12, out_channels=8)
    #   x1: (4, 8, 8, 8)   -> up   -> (4, 8, 16, 16)
    #   x2: (4, 4, 16, 16) -> cat  -> (4, 12, 16, 16) -> conv+relu -> (4, 8, 16, 16)
    N, Cin, Cmid, Cout, H, W = 4, 8, 12, 8, 8, 8
    Cskip = Cmid - Cout

    key = jax.random.PRNGKey(0)
    k1, k2, k3, k4, k5, k6 = jax.random.split(key, 6)

    x1 = jax.random.normal(k1, (N, Cin, H, W), jnp.float32)
    x2 = jax.random.normal(k2, (N, Cskip, 2 * H, 2 * W), jnp.float32)

    params = {
        # nn.ConvTranspose2d(in, out, 2, 2): weight (Cin, Cout, 2, 2)
        "up_w": jax.random.normal(k3, (Cin, Cout, 2, 2), jnp.float32) * 0.1,
        "up_b": jax.random.normal(k4, (Cout,), jnp.float32) * 0.1,
        # nn.Conv2d(mid, out, 3, padding=1): weight (Cout, Cmid, 3, 3)
        "conv_w": jax.random.normal(k5, (Cout, Cmid, 3, 3), jnp.float32) * 0.1,
        "conv_b": jax.random.normal(k6, (Cout,), jnp.float32) * 0.1,
    }

    fwd = jax.jit(decoder_forward)
    out = jax.block_until_ready(fwd(x1, x2, params))
    ref = jax.block_until_ready(decoder_reference(x1, x2, params))

    assert out.shape == (N, Cout, 2 * H, 2 * W), out.shape
    max_err = float(jnp.max(jnp.abs(out - ref)))
    # bf16 activations/weights with f32 accumulation -> loose-ish tolerance.
    assert jnp.allclose(out, ref, atol=3e-2, rtol=3e-2), f"mismatch vs reference (max |err|={max_err})"

    print("KERNEL_OK")
</pallas_src>

<mosaic_0001>
module attributes {stable_mosaic.version = 11 : i64} {
  func.func @_decoder_kernel(%arg0: i32, %arg1: memref<1x8x64xbf16, #tpu.memory_space<vmem>>, %arg2: memref<1x2x8x64xbf16, #tpu.memory_space<vmem>>, %arg3: memref<2x64x128xbf16, #tpu.memory_space<vmem>>, %arg4: memref<3x128x128xbf16, #tpu.memory_space<vmem>>, %arg5: memref<3x64x128xbf16, #tpu.memory_space<vmem>>, %arg6: memref<1x128xf32, #tpu.memory_space<vmem>>, %arg7: memref<1x128xf32, #tpu.memory_space<vmem>>, %arg8: memref<1x8x256xf32, #tpu.memory_space<vmem>>) attributes {dimension_semantics = [#tpu.dimension_semantics<parallel>], iteration_bounds = array<i64: 4>, scalar_prefetch = 0 : i64, scratch_operands = 0 : i64, tpu.core_type = #tpu.core_type<tc>, window_params = [{transform_indices = @transform_0, window_bounds = array<i64: 1, 8, 64>}, {transform_indices = @transform_1, window_bounds = array<i64: 1, 2, 8, 64>}, {pipeline_mode = #tpu.pipeline_mode<synchronous>, transform_indices = @transform_2, window_bounds = array<i64: 2, 64, 128>}, {pipeline_mode = #tpu.pipeline_mode<synchronous>, transform_indices = @transform_3, window_bounds = array<i64: 3, 128, 128>}, {pipeline_mode = #tpu.pipeline_mode<synchronous>, transform_indices = @transform_4, window_bounds = array<i64: 3, 64, 128>}, {pipeline_mode = #tpu.pipeline_mode<synchronous>, transform_indices = @transform_5, window_bounds = array<i64: 1, 128>}, {pipeline_mode = #tpu.pipeline_mode<synchronous>, transform_indices = @transform_6, window_bounds = array<i64: 1, 128>}, {transform_indices = @transform_7, window_bounds = array<i64: 1, 8, 256>}]} {
    %c0 = arith.constant 0 : index
    %c0_0 = arith.constant 0 : index
    %c0_1 = arith.constant 0 : index
    %0 = vector.load %arg1[%c0, %c0_0, %c0_1] : memref<1x8x64xbf16, #tpu.memory_space<vmem>>, vector<1x8x64xbf16>
    %1 = vector.shape_cast %0 : vector<1x8x64xbf16> to vector<8x64xbf16>
    %c0_2 = arith.constant 0 : index
    %c0_3 = arith.constant 0 : index
    %c0_4 = arith.constant 0 : index
    %c0_5 = arith.constant 0 : index
    %2 = vector.load %arg2[%c0_2, %c0_3, %c0_4, %c0_5] : memref<1x2x8x64xbf16, #tpu.memory_space<vmem>>, vector<1x1x8x64xbf16>
    %3 = vector.shape_cast %2 : vector<1x1x8x64xbf16> to vector<8x64xbf16>
    %c0_6 = arith.constant 0 : index
    %c1 = arith.constant 1 : index
    %c0_7 = arith.constant 0 : index
    %c0_8 = arith.constant 0 : index
    %4 = vector.load %arg2[%c0_6, %c1, %c0_7, %c0_8] : memref<1x2x8x64xbf16, #tpu.memory_space<vmem>>, vector<1x1x8x64xbf16>
    %5 = vector.shape_cast %4 : vector<1x1x8x64xbf16> to vector<8x64xbf16>
    %c0_9 = arith.constant 0 : index
    %c0_10 = arith.constant 0 : index
    %6 = vector.load %arg6[%c0_9, %c0_10] : memref<1x128xf32, #tpu.memory_space<vmem>>, vector<1x128xf32>
    %c0_11 = arith.constant 0 : index
    %c0_12 = arith.constant 0 : index
    %c0_13 = arith.constant 0 : index
    %7 = vector.load %arg3[%c0_11, %c0_12, %c0_13] : memref<2x64x128xbf16, #tpu.memory_space<vmem>>, vector<1x64x128xbf16>
    %8 = vector.shape_cast %7 : vector<1x64x128xbf16> to vector<64x128xbf16>
    %cst = arith.constant dense<0.000000e+00> : vector<8x128xf32>
    %9 = tpu.matmul %1, %8, %cst {dimension_numbers = #tpu.dot_dimension_numbers<[1], [0], [0], [1], [0, 0, 1, 1], [], []>} : vector<8x64xbf16>, vector<64x128xbf16>, vector<8x128xf32> -> vector<8x128xf32>
    %10 = vector.broadcast %6 : vector<1x128xf32> to vector<8x128xf32>
    %11 = arith.addf %9, %10 : vector<8x128xf32>
    %c1_14 = arith.constant 1 : index
    %c0_15 = arith.constant 0 : index
    %c0_16 = arith.constant 0 : index
    %12 = vector.load %arg3[%c1_14, %c0_15, %c0_16] : memref<2x64x128xbf16, #tpu.memory_space<vmem>>, vector<1x64x128xbf16>
    %13 = vector.shape_cast %12 : vector<1x64x128xbf16> to vector<64x128xbf16>
    %cst_17 = arith.constant dense<0.000000e+00> : vector<8x128xf32>
    %14 = tpu.matmul %1, %13, %cst_17 {dimension_numbers = #tpu.dot_dimension_numbers<[1], [0], [0], [1], [0, 0, 1, 1], [], []>} : vector<8x64xbf16>, vector<64x128xbf16>, vector<8x128xf32> -> vector<8x128xf32>
    %15 = vector.broadcast %6 : vector<1x128xf32> to vector<8x128xf32>
    %16 = arith.addf %14, %15 : vector<8x128xf32>
    %17 = tpu.iota {dimensions = array<i32: 0>} : vector<8x8xi32>
    %18 = tpu.iota {dimensions = array<i32: 1>} : vector<8x8xi32>
    %c1_i32 = arith.constant 1 : i32
    %19 = vector.broadcast %c1_i32 : i32 to vector<8x8xi32>
    %20 = arith.subi %17, %19 : vector<8x8xi32>
    %21 = arith.cmpi eq, %18, %20 : vector<8x8xi32>
    %22 = arith.extui %21 : vector<8x8xi1> to vector<8x8xi32>
    %23 = arith.sitofp %22 : vector<8x8xi32> to vector<8x8xf32>
    %c1_i32_18 = arith.constant 1 : i32
    %24 = vector.broadcast %c1_i32_18 : i32 to vector<8x8xi32>
    %25 = arith.addi %17, %24 : vector<8x8xi32>
    %26 = arith.cmpi eq, %18, %25 : vector<8x8xi32>
    %27 = arith.extui %26 : vector<8x8xi1> to vector<8x8xi32>
    %28 = arith.sitofp %27 : vector<8x8xi32> to vector<8x8xf32>
    %cst_19 = arith.constant dense<0.000000e+00> : vector<8x128xf32>
    %29 = tpu.matmul %23, %16, %cst_19 {dimension_numbers = #tpu.dot_dimension_numbers<[1], [0], [0], [1], [0, 0, 1, 1], [], []>} : vector<8x8xf32>, vector<8x128xf32>, vector<8x128xf32> -> vector<8x128xf32>
    %cst_20 = arith.constant dense<0.000000e+00> : vector<8x128xf32>
    %30 = tpu.matmul %28, %11, %cst_20 {dimension_numbers = #tpu.dot_dimension_numbers<[1], [0], [0], [1], [0, 0, 1, 1], [], []>} : vector<8x8xf32>, vector<8x128xf32>, vector<8x128xf32> -> vector<8x128xf32>
    %cst_21 = arith.constant dense<0.000000e+00> : vector<8x64xf32>
    %31 = tpu.matmul %23, %5, %cst_21 {dimension_numbers = #tpu.dot_dimension_numbers<[1], [0], [0], [1], [0, 0, 1, 1], [], []>} : vector<8x8xf32>, vector<8x64xbf16>, vector<8x64xf32> -> vector<8x64xf32>
    %cst_22 = arith.constant dense<0.000000e+00> : vector<8x64xf32>
    %32 = tpu.matmul %28, %3, %cst_22 {dimension_numbers = #tpu.dot_dimension_numbers<[1], [0], [0], [1], [0, 0, 1, 1], [], []>} : vector<8x8xf32>, vector<8x64xbf16>, vector<8x64xf32> -> vector<8x64xf32>
    %c0_23 = arith.constant 0 : index
    %c0_24 = arith.constant 0 : index
    %33 = vector.load %arg7[%c0_23, %c0_24] : memref<1x128xf32, #tpu.memory_space<vmem>>, vector<1x128xf32>
    %c0_25 = arith.constant 0 : index
    %c0_26 = arith.constant 0 : index
    %c0_27 = arith.constant 0 : index
    %34 = vector.load %arg4[%c0_25, %c0_26, %c0_27] : memref<3x128x128xbf16, #tpu.memory_space<vmem>>, vector<1x128x128xbf16>
    %35 = vector.shape_cast %34 : vector<1x128x128xbf16> to vector<128x128xbf16>
    %cst_28 = arith.constant dense<0.000000e+00> : vector<8x128xf32>
    %36 = tpu.matmul %29, %35, %cst_28 {dimension_numbers = #tpu.dot_dimension_numbers<[1], [0], [0], [1], [0, 0, 1, 1], [], []>} : vector<8x128xf32>, vector<128x128xbf16>, vector<8x128xf32> -> vector<8x128xf32>
    %c1_29 = arith.constant 1 : index
    %c0_30 = arith.constant 0 : index
    %c0_31 = arith.constant 0 : index
    %37 = vector.load %arg4[%c1_29, %c0_30, %c0_31] : memref<3x128x128xbf16, #tpu.memory_space<vmem>>, vector<1x128x128xbf16>
    %38 = vector.shape_cast %37 : vector<1x128x128xbf16> to vector<128x128xbf16>
    %cst_32 = arith.constant dense<0.000000e+00> : vector<8x128xf32>
    %39 = tpu.matmul %11, %38, %cst_32 {dimension_numbers = #tpu.dot_dimension_numbers<[1], [0], [0], [1], [0, 0, 1, 1], [], []>} : vector<8x128xf32>, vector<128x128xbf16>, vector<8x128xf32> -> vector<8x128xf32>
    %40 = arith.addf %36, %39 : vector<8x128xf32>
    %c2 = arith.constant 2 : index
    %c0_33 = arith.constant 0 : index
    %c0_34 = arith.constant 0 : index
    %41 = vector.load %arg4[%c2, %c0_33, %c0_34] : memref<3x128x128xbf16, #tpu.memory_space<vmem>>, vector<1x128x128xbf16>
    %42 = vector.shape_cast %41 : vector<1x128x128xbf16> to vector<128x128xbf16>
    %cst_35 = arith.constant dense<0.000000e+00> : vector<8x128xf32>
    %43 = tpu.matmul %16, %42, %cst_35 {dimension_numbers = #tpu.dot_dimension_numbers<[1], [0], [0], [1], [0, 0, 1, 1], [], []>} : vector<8x128xf32>, vector<128x128xbf16>, vector<8x128xf32> -> vector<8x128xf32>
    %44 = arith.addf %40, %43 : vector<8x128xf32>
    %c0_36 = arith.constant 0 : index
    %c0_37 = arith.constant 0 : index
    %c0_38 = arith.constant 0 : index
    %45 = vector.load %arg5[%c0_36, %c0_37, %c0_38] : memref<3x64x128xbf16, #tpu.memory_space<vmem>>, vector<1x64x128xbf16>
    %46 = vector.shape_cast %45 : vector<1x64x128xbf16> to vector<64x128xbf16>
    %cst_39 = arith.constant dense<0.000000e+00> : vector<8x128xf32>
    %47 = tpu.matmul %31, %46, %cst_39 {dimension_numbers = #tpu.dot_dimension_numbers<[1], [0], [0], [1], [0, 0, 1, 1], [], []>} : vector<8x64xf32>, vector<64x128xbf16>, vector<8x128xf32> -> vector<8x128xf32>
    %48 = arith.addf %44, %47 : vector<8x128xf32>
    %c1_40 = arith.constant 1 : index
    %c0_41 = arith.constant 0 : index
    %c0_42 = arith.constant 0 : index
    %49 = vector.load %arg5[%c1_40, %c0_41, %c0_42] : memref<3x64x128xbf16, #tpu.memory_space<vmem>>, vector<1x64x128xbf16>
    %50 = vector.shape_cast %49 : vector<1x64x128xbf16> to vector<64x128xbf16>
    %cst_43 = arith.constant dense<0.000000e+00> : vector<8x128xf32>
    %51 = tpu.matmul %3, %50, %cst_43 {dimension_numbers = #tpu.dot_dimension_numbers<[1], [0], [0], [1], [0, 0, 1, 1], [], []>} : vector<8x64xbf16>, vector<64x128xbf16>, vector<8x128xf32> -> vector<8x128xf32>
    %52 = arith.addf %48, %51 : vector<8x128xf32>
    %c2_44 = arith.constant 2 : index
    %c0_45 = arith.constant 0 : index
    %c0_46 = arith.constant 0 : index
    %53 = vector.load %arg5[%c2_44, %c0_45, %c0_46] : memref<3x64x128xbf16, #tpu.memory_space<vmem>>, vector<1x64x128xbf16>
    %54 = vector.shape_cast %53 : vector<1x64x128xbf16> to vector<64x128xbf16>
    %cst_47 = arith.constant dense<0.000000e+00> : vector<8x128xf32>
    %55 = tpu.matmul %5, %54, %cst_47 {dimension_numbers = #tpu.dot_dimension_numbers<[1], [0], [0], [1], [0, 0, 1, 1], [], []>} : vector<8x64xbf16>, vector<64x128xbf16>, vector<8x128xf32> -> vector<8x128xf32>
    %56 = arith.addf %52, %55 : vector<8x128xf32>
    %57 = vector.broadcast %33 : vector<1x128xf32> to vector<8x128xf32>
    %58 = arith.addf %56, %57 : vector<8x128xf32>
    %c0_48 = arith.constant 0 : index
    %c0_49 = arith.constant 0 : index
    %c0_50 = arith.constant 0 : index
    %59 = vector.load %arg4[%c0_48, %c0_49, %c0_50] : memref<3x128x128xbf16, #tpu.memory_space<vmem>>, vector<1x128x128xbf16>
    %60 = vector.shape_cast %59 : vector<1x128x128xbf16> to vector<128x128xbf16>
    %cst_51 = arith.constant dense<0.000000e+00> : vector<8x128xf32>
    %61 = tpu.matmul %11, %60, %cst_51 {dimension_numbers = #tpu.dot_dimension_numbers<[1], [0], [0], [1], [0, 0, 1, 1], [], []>} : vector<8x128xf32>, vector<128x128xbf16>, vector<8x128xf32> -> vector<8x128xf32>
    %c1_52 = arith.constant 1 : index
    %c0_53 = arith.constant 0 : index
    %c0_54 = arith.constant 0 : index
    %62 = vector.load %arg4[%c1_52, %c0_53, %c0_54] : memref<3x128x128xbf16, #tpu.memory_space<vmem>>, vector<1x128x128xbf16>
    %63 = vector.shape_cast %62 : vector<1x128x128xbf16> to vector<128x128xbf16>
    %cst_55 = arith.constant dense<0.000000e+00> : vector<8x128xf32>
    %64 = tpu.matmul %16, %63, %cst_55 {dimension_numbers = #tpu.dot_dimension_numbers<[1], [0], [0], [1], [0, 0, 1, 1], [], []>} : vector<8x128xf32>, vector<128x128xbf16>, vector<8x128xf32> -> vector<8x128xf32>
    %65 = arith.addf %61, %64 : vector<8x128xf32>
    %c2_56 = arith.constant 2 : index
    %c0_57 = arith.constant 0 : index
    %c0_58 = arith.constant 0 : index
    %66 = vector.load %arg4[%c2_56, %c0_57, %c0_58] : memref<3x128x128xbf16, #tpu.memory_space<vmem>>, vector<1x128x128xbf16>
    %67 = vector.shape_cast %66 : vector<1x128x128xbf16> to vector<128x128xbf16>
    %cst_59 = arith.constant dense<0.000000e+00> : vector<8x128xf32>
    %68 = tpu.matmul %30, %67, %cst_59 {dimension_numbers = #tpu.dot_dimension_numbers<[1], [0], [0], [1], [0, 0, 1, 1], [], []>} : vector<8x128xf32>, vector<128x128xbf16>, vector<8x128xf32> -> vector<8x128xf32>
    %69 = arith.addf %65, %68 : vector<8x128xf32>
    %c0_60 = arith.constant 0 : index
    %c0_61 = arith.constant 0 : index
    %c0_62 = arith.constant 0 : index
    %70 = vector.load %arg5[%c0_60, %c0_61, %c0_62] : memref<3x64x128xbf16, #tpu.memory_space<vmem>>, vector<1x64x128xbf16>
    %71 = vector.shape_cast %70 : vector<1x64x128xbf16> to vector<64x128xbf16>
    %cst_63 = arith.constant dense<0.000000e+00> : vector<8x128xf32>
    %72 = tpu.matmul %3, %71, %cst_63 {dimension_numbers = #tpu.dot_dimension_numbers<[1], [0], [0], [1], [0, 0, 1, 1], [], []>} : vector<8x64xbf16>, vector<64x128xbf16>, vector<8x128xf32> -> vector<8x128xf32>
    %73 = arith.addf %69, %72 : vector<8x128xf32>
    %c1_64 = arith.constant 1 : index
    %c0_65 = arith.constant 0 : index
    %c0_66 = arith.constant 0 : index
    %74 = vector.load %arg5[%c1_64, %c0_65, %c0_66] : memref<3x64x128xbf16, #tpu.memory_space<vmem>>, vector<1x64x128xbf16>
    %75 = vector.shape_cast %74 : vector<1x64x128xbf16> to vector<64x128xbf16>
    %cst_67 = arith.constant dense<0.000000e+00> : vector<8x128xf32>
    %76 = tpu.matmul %5, %75, %cst_67 {dimension_numbers = #tpu.dot_dimension_numbers<[1], [0], [0], [1], [0, 0, 1, 1], [], []>} : vector<8x64xbf16>, vector<64x128xbf16>, vector<8x128xf32> -> vector<8x128xf32>
    %77 = arith.addf %73, %76 : vector<8x128xf32>
    %c2_68 = arith.constant 2 : index
    %c0_69 = arith.constant 0 : index
    %c0_70 = arith.constant 0 : index
    %78 = vector.load %arg5[%c2_68, %c0_69, %c0_70] : memref<3x64x128xbf16, #tpu.memory_space<vmem>>, vector<1x64x128xbf16>
    %79 = vector.shape_cast %78 : vector<1x64x128xbf16> to vector<64x128xbf16>
    %cst_71 = arith.constant dense<0.000000e+00> : vector<8x128xf32>
    %80 = tpu.matmul %32, %79, %cst_71 {dimension_numbers = #tpu.dot_dimension_numbers<[1], [0], [0], [1], [0, 0, 1, 1], [], []>} : vector<8x64xf32>, vector<64x128xbf16>, vector<8x128xf32> -> vector<8x128xf32>
    %81 = arith.addf %77, %80 : vector<8x128xf32>
    %82 = vector.broadcast %33 : vector<1x128xf32> to vector<8x128xf32>
    %83 = arith.addf %81, %82 : vector<8x128xf32>
    %cst_72 = arith.constant 0.000000e+00 : f32
    %84 = vector.broadcast %cst_72 : f32 to vector<8x128xf32>
    %85 = arith.maximumf %58, %84 : vector<8x128xf32>
    %c0_73 = arith.constant 0 : index
    %c0_74 = arith.constant 0 : index
    %c0_75 = arith.constant 0 : index
    %86 = vector.load %arg8[%c0_73, %c0_74, %c0_75] : memref<1x8x256xf32, #tpu.memory_space<vmem>>, vector<1x8x128xf32>
    %87 = vector.shape_cast %86 : vector<1x8x128xf32> to vector<8x128xf32>
    %88 = vector.shape_cast %85 : vector<8x128xf32> to vector<1x8x128xf32>
    tpu.vector_store %arg8[%c0_73, %c0_74, %c0_75], %88 {strides = array<i32>} : memref<1x8x256xf32, #tpu.memory_space<vmem>>, vector<1x8x128xf32>,
    %cst_76 = arith.constant 0.000000e+00 : f32
    %89 = vector.broadcast %cst_76 : f32 to vector<8x128xf32>
    %90 = arith.maximumf %83, %89 : vector<8x128xf32>
    %c0_77 = arith.constant 0 : index
    %c0_78 = arith.constant 0 : index
    %c128 = arith.constant 128 : index
    %91 = vector.load %arg8[%c0_77, %c0_78, %c128] : memref<1x8x256xf32, #tpu.memory_space<vmem>>, vector<1x8x128xf32>
    %92 = vector.shape_cast %91 : vector<1x8x128xf32> to vector<8x128xf32>
    %93 = vector.shape_cast %90 : vector<8x128xf32> to vector<1x8x128xf32>
    tpu.vector_store %arg8[%c0_77, %c0_78, %c128], %93 {strides = array<i32>} : memref<1x8x256xf32, #tpu.memory_space<vmem>>, vector<1x8x128xf32>,
    return
  }
  func.func @transform_0(%arg0: i32) -> (i32, i32, i32) {
    %c0_i32 = arith.constant 0 : i32
    %c0_i32_0 = arith.constant 0 : i32
    %c0_i32_1 = arith.constant 0 : i32
    return %arg0, %c0_i32, %c0_i32_0 : i32, i32, i32
  }
  func.func @transform_1(%arg0: i32) -> (i32, i32, i32, i32) {
    %c0_i32 = arith.constant 0 : i32
    %c0_i32_0 = arith.constant 0 : i32
    %c0_i32_1 = arith.constant 0 : i32
    %c0_i32_2 = arith.constant 0 : i32
    return %arg0, %c0_i32, %c0_i32_0, %c0_i32_1 : i32, i32, i32, i32
  }
  func.func @transform_2(%arg0: i32) -> (i32, i32, i32) {
    %c0_i32 = arith.constant 0 : i32
    %c0_i32_0 = arith.constant 0 : i32
    %c0_i32_1 = arith.constant 0 : i32
    %c0_i32_2 = arith.constant 0 : i32
    return %c0_i32, %c0_i32_0, %c0_i32_1 : i32, i32, i32
  }
  func.func @transform_3(%arg0: i32) -> (i32, i32, i32) {
    %c0_i32 = arith.constant 0 : i32
    %c0_i32_0 = arith.constant 0 : i32
    %c0_i32_1 = arith.constant 0 : i32
    %c0_i32_2 = arith.constant 0 : i32
    return %c0_i32, %c0_i32_0, %c0_i32_1 : i32, i32, i32
  }
  func.func @transform_4(%arg0: i32) -> (i32, i32, i32) {
    %c0_i32 = arith.constant 0 : i32
    %c0_i32_0 = arith.constant 0 : i32
    %c0_i32_1 = arith.constant 0 : i32
    %c0_i32_2 = arith.constant 0 : i32
    return %c0_i32, %c0_i32_0, %c0_i32_1 : i32, i32, i32
  }
  func.func @transform_5(%arg0: i32) -> (i32, i32) {
    %c0_i32 = arith.constant 0 : i32
    %c0_i32_0 = arith.constant 0 : i32
    %c0_i32_1 = arith.constant 0 : i32
    return %c0_i32, %c0_i32_0 : i32, i32
  }
  func.func @transform_6(%arg0: i32) -> (i32, i32) {
    %c0_i32 = arith.constant 0 : i32
    %c0_i32_0 = arith.constant 0 : i32
    %c0_i32_1 = arith.constant 0 : i32
    return %c0_i32, %c0_i32_0 : i32, i32
  }
  func.func @transform_7(%arg0: i32) -> (i32, i32, i32) {
    %c0_i32 = arith.constant 0 : i32
    %c0_i32_0 = arith.constant 0 : i32
    %c0_i32_1 = arith.constant 0 : i32
    return %arg0, %c0_i32, %c0_i32_0 : i32, i32, i32
  }
}

</mosaic_0001>

<bundles_post_ra>
// kernel: tile.13
= control target key start
LH: loop header
LB: loop body
LE: loop exit
PB: predicated region body
PF: predicated region fallthrough
CT: control target
= control target key end

     0   :  { %s28_s0 = inlined_call_operand.vmem [shape: f32[8], index: 0, kind: input, shape index: {}]   ;;  %s29_s1 = inlined_call_operand.vmem [shape: f32[16,8], index: 1, kind: output, shape index: {}]  }
   0x1   :  { %v4_v0 = vld [vmem:[%s28_s0] ss:$0 sm:$0xff] }
   0x2   :  { %5 = vst [vmem:[%s29_s1] sm:$0xff] %v4_v0  ;;  %8 = vst [vmem:[%s29_s1 + $0x8] sm:$0xff] %v4_v0 }

// kernel: tile.14
= control target key start
LH: loop header
LB: loop body
LE: loop exit
PB: predicated region body
PF: predicated region fallthrough
CT: control target
= control target key end

     0   :  { %s131_s10 = smov 120   ;;  %s132_s11 = smov 104   ;;  %vm3_vm0 = vcmask 64512   ;;  %vm9_vm1 = vcmask 1048512   ;;  %vm15_vm2 = vcmask 982912   ;;  %vm21_vm3 = vcmask 917312   ;;  %s207_s0 = inlined_call_operand.vmem [shape: f32[16,8], index: 0, kind: input, shape index: {}]   ;;  %s208_s1 = inlined_call_operand.vmem [shape: f32[1,128], index: 1, kind: output, shape index: {}]  }
   0x1   :  { %v101_v0 = vld [vmem:[%s207_s0 + $0xf] sm:$0x1]   ;;  %v103_v1 = vld [vmem:[%s207_s0 + $0xd] sm:$0x1]   ;;  %v102_v2 = vld [vmem:[%s207_s0 + $0xe] sm:$0x1]  }
   0x2   :  { %7 = vrot.lane.b32.xlu0 %v101_v0, %s131_s10  ;;  %19 = vrot.lane.b32.xlu1 %v103_v1, %s132_s11  ;;  %v104_v3 = vld [vmem:[%s207_s0 + $0xc] sm:$0x1]   ;;  %s133_s16 = smov 112   ;;  %s134_s17 = smov 96   ;;  %v105_v4 = vld [vmem:[%s207_s0 + $0xb] sm:$0x1]  }
   0x3   :  { %v106_v5 = vld [vmem:[%s207_s0 + $0xa] sm:$0x1]   ;;  %v2_v6 = vld [vmem:[%s207_s0] sm:$0x1]   ;;  %s135_s24 = smov 88   ;;  %s136_s25 = smov 80  }
   0x4   :  { %4 = vst.msk [vmem:[#allocation0] sm:$0x1] %vm3_vm0, %v2_v6   ;;  %v107_v7 = vld [vmem:[%s207_s0 + $0x9] sm:$0x1]   ;;  %v108_v8 = vld [vmem:[%s207_s0 + $0x8] sm:$0x1]  }
   0x5   :  { %s137_s30 = smov 72   ;;  %s138_s2 = smov 64   ;;  %v109_v9 = vld [vmem:[%s207_s0 + $0x7] sm:$0x1]   ;;  %v110_v10 = vld [vmem:[%s207_s0 + $0x6] sm:$0x1]  }
   0x6   :  { %13 = vrot.lane.b32.xlu0 %v102_v2, %s133_s16  ;;  %25 = vrot.lane.b32.xlu1 %v104_v3, %s134_s17  ;;  %s139_s7 = smov 56   ;;  %s140_s8 = smov 48   ;;  %v111_v11 = vld [vmem:[%s207_s0 + $0x5] sm:$0x1]   ;;  %v112_v12 = vld [vmem:[%s207_s0 + $0x4] sm:$0x1]  }
   0x7   :  { %s141_s13 = smov 40   ;;  %s142_s14 = smov 32   ;;  %v113_v13 = vld [vmem:[%s207_s0 + $0x3] sm:$0x1]   ;;  %v114_v14 = vld [vmem:[%s207_s0 + $0x2] sm:$0x1]  }
   0x8   :  { %s143_s19 = smov 24   ;;  %s144_s20 = smov 16   ;;  %v115_v15 = vld [vmem:[%s207_s0 + $0x1] sm:$0x1]   ;;  %vm27_vm4 = vcmask 851712   ;;  %vm33_vm5 = vcmask 786112  }
   0x9   :  { %s145_s0 = smov 8   ;;  %vm39_vm6 = vcmask 720512   ;;  %vm45_vm7 = vcmask 654912   ;;  %vm51_vm8 = vcmask 589312   ;;  %vm57_vm9 = vcmask 523712  }
   0xa   :  { %31 = vrot.lane.b32.xlu0 %v105_v4, %s135_s24  ;;  %37 = vrot.lane.b32.xlu1 %v106_v5, %s136_s25  ;;  %vm63_vm10 = vcmask 458112   ;;  %vm69_vm11 = vcmask 392512   ;;  %vm75_vm12 = vcmask 326912   ;;  %vm81_vm13 = vcmask 261312  }
   0xb   :  { %vm87_vm14 = vcmask 195712   ;;  %vm93_vm15 = vcmask 130112  }
   0xe   :  { %43 = vrot.lane.b32.xlu0 %v107_v7, %s137_s30  ;;  %49 = vrot.lane.b32.xlu1 %v108_v8, %s138_s2 }
  0x12   :  { %55 = vrot.lane.b32.xlu0 %v109_v9, %s139_s7  ;;  %61 = vrot.lane.b32.xlu1 %v110_v10, %s140_s8 }
  0x16   :  { %67 = vrot.lane.b32.xlu0 %v111_v11, %s141_s13  ;;  %73 = vrot.lane.b32.xlu1 %v112_v12, %s142_s14 }
  0x1a   :  { %79 = vrot.lane.b32.xlu0 %v113_v13, %s143_s19  ;;  %85 = vrot.lane.b32.xlu1 %v114_v14, %s144_s20 }
  0x1e   :  { %91 = vrot.lane.b32.xlu0 %v115_v15, %s145_s0 }
  0x74   :  { %v8_v16 = vpop.permute.xlu0 %7   ;;  %v20_v17 = vpop.permute.xlu1 %19  }
  0x75   :  { %10 = vst.msk [vmem:[#allocation0] sm:$0x1] %vm9_vm1, %v8_v16  }
  0x78   :  { %v14_v18 = vpop.permute.xlu0 %13   ;;  %v26_v19 = vpop.permute.xlu1 %25  }
  0x79   :  { %16 = vst.msk [vmem:[#allocation0] sm:$0x1] %vm15_vm2, %v14_v18  }
  0x7a   :  { %22 = vst.msk [vmem:[#allocation0] sm:$0x1] %vm21_vm3, %v20_v17  }
  0x7b   :  { %28 = vst.msk [vmem:[#allocation0] sm:$0x1] %vm27_vm4, %v26_v19  }
  0x7c   :  { %v32_v20 = vpop.permute.xlu0 %31   ;;  %v38_v21 = vpop.permute.xlu1 %37  }
  0x7d   :  { %34 = vst.msk [vmem:[#allocation0] sm:$0x1] %vm33_vm5, %v32_v20  }
  0x7e   :  { %40 = vst.msk [vmem:[#allocation0] sm:$0x1] %vm39_vm6, %v38_v21  }
  0x80   :  { %v44_v22 = vpop.permute.xlu0 %43   ;;  %v50_v23 = vpop.permute.xlu1 %49  }
  0x81   :  { %46 = vst.msk [vmem:[#allocation0] sm:$0x1] %vm45_vm7, %v44_v22  }
  0x82   :  { %52 = vst.msk [vmem:[#allocation0] sm:$0x1] %vm51_vm8, %v50_v23  }
  0x84   :  { %v56_v24 = vpop.permute.xlu0 %55   ;;  %v62_v25 = vpop.permute.xlu1 %61  }
  0x85   :  { %58 = vst.msk [vmem:[#allocation0] sm:$0x1] %vm57_vm9, %v56_v24  }
  0x86   :  { %64 = vst.msk [vmem:[#allocation0] sm:$0x1] %vm63_vm10, %v62_v25  }
  0x88   :  { %v68_v26 = vpop.permute.xlu0 %67   ;;  %v74_v27 = vpop.permute.xlu1 %73  }
  0x89   :  { %70 = vst.msk [vmem:[#allocation0] sm:$0x1] %vm69_vm11, %v68_v26  }
  0x8a   :  { %76 = vst.msk [vmem:[#allocation0] sm:$0x1] %vm75_vm12, %v74_v27  }
  0x8c   :  { %v80_v28 = vpop.permute.xlu0 %79   ;;  %v86_v29 = vpop.permute.xlu1 %85  }
  0x8d   :  { %82 = vst.msk [vmem:[#allocation0] sm:$0x1] %vm81_vm13, %v80_v28  }
  0x8e   :  { %88 = vst.msk [vmem:[#allocation0] sm:$0x1] %vm87_vm14, %v86_v29  }
  0x90   :  { %v92_v30 = vpop.permute.xlu0 %91  }
  0x91   :  { %94 = vst.msk [vmem:[#allocation0] sm:$0x1] %vm93_vm15, %v92_v30  }
  0x98   :  { %v98_v31 = vld [vmem:[#allocation0] sm:$0x1] }
  0x99   :  { %100 = vst [vmem:[%s208_s1] sm:$0x1] %v98_v31 }

// kernel: decoder_forward.1
= control target key start
LH: loop header
LB: loop body
LE: loop exit
PB: predicated region body
PF: predicated region fallthrough
CT: control target
= control target key end

     0   :  { %s2129_s24 = smov 0   ;;  %s2480_s0 = inlined_call_operand.vmem [shape: bf16[4,8,64], index: 0, kind: input, shape index: {}]   ;;  %s2481_s1 = inlined_call_operand.vmem [shape: bf16[4,2,8,64], index: 1, kind: input, shape index: {}]   ;;  %s2482_s2 = inlined_call_operand.vmem [shape: bf16[2,64,128], index: 2, kind: input, shape index: {}]   ;;  %s2483_s3 = inlined_call_operand.vmem [shape: bf16[3,128,128], index: 3, kind: input, shape index: {}]   ;;  %s2484_s4 = inlined_call_operand.vmem [shape: bf16[3,64,128], index: 4, kind: input, shape index: {}]   ;;  %s2485_s5 = inlined_call_operand.vmem [shape: f32[1,128], index: 5, kind: input, shape index: {}]   ;;  %s2486_s6 = inlined_call_operand.vmem [shape: f32[1,128], index: 6, kind: input, shape index: {}]   ;;  %s2487_s7 = inlined_call_operand.vmem [shape: f32[4,8,256], index: 7, kind: output, shape index: {}]  }
   0x1 LB: > { %s1553_s25 = sadd.s32 4294967295, %s2085_s24   ;;  %p1557_p0 = scmp.ge.s32.totalorder %s2085_s24, 1  ;;  %s2085_s24 = sphi %s2129_s24, %s17_s24  }
   0x2   : > { %p246_p1 = scmp.lt.s32.totalorder %s2085_s24, 5 }
   0x4   : > { %p247_p2 = pnand %p1557_p0, %p246_p1 }
   0x5   : > { %v2035_v0 = vld [vmem:[%s2482_s2] sm:$0xff] (!%p247_p2)   ;;  %v2087_v1 = vmov (!%p247_p2), 0.0   ;;  %v2037_v3 = vld [vmem:[%s2482_s2 + $0x8] sm:$0xff] (!%p247_p2)   ;;  %vm2088_vm0 = vmmov (!%p247_p2), 0   ;;  %p282_p3 = scmp.lt.s32.totalorder (!%p247_p2), %s1553_s25, 3  ;;  %v2039_v5 = vld [vmem:[%s2482_s2 + $0x10] sm:$0xff] (!%p247_p2)   ;;  %v457_v10 = vlaneseq (!%p247_p2) }
   0x6   : > { %250 = sbr.rel (%p247_p2) target bundleno = 751 (0x2ef), region = 48  ;;  %1787 = vmatprep.subr.bf16.mxu0 (!%p247_p2), %v2087_v1  ;;  %1799 = vmatprep.subr.bf16.mxu1 (!%p247_p2), %v2087_v1  ;;  %v2036_v2 = vld [vmem:[%s2482_s2 + $0x20] sm:$0xff] (!%p247_p2)   ;;  %v2038_v4 = vld [vmem:[%s2482_s2 + $0x28] sm:$0xff] (!%p247_p2)   ;;  %v2040_v6 = vld [vmem:[%s2482_s2 + $0x30] sm:$0xff] (!%p247_p2)   ;;  %vm340_vm1 = vcmask (!%p247_p2), 523264   ;;  %vm616_vm4 = vcmask (!%p247_p2), 1043456  }
   0x7   : > { %1788 = vmatpush3.bf16.msra.mxu0 (!%p247_p2), %v2035_v0  ;;  %1795 = vmatprep.mubr.msk.bf16.mxu0 (!%p247_p2), %vm2088_vm0, %v2087_v1  ;;  %v2041_v7 = vld [vmem:[%s2482_s2 + $0x18] sm:$0xff] (!%p247_p2)   ;;  %v458_v11 = vshrl.u32 (!%p247_p2), %v457_v10, 7  ;;  %v460_v12 = vand.u32 (!%p247_p2), 127, %v457_v10  ;;  %v1564_v15 = vld [vmem:[%s2485_s5] ss:$0 sm:$0xff] (!%p247_p2)  ;;  %vm469_vm5 = vcmask (!%p247_p2), 64512  }
   0x8   : > { %1800 = vmatpush3.bf16.msra.mxu1 (!%p247_p2), %v2036_v2  ;;  %1789 = vmatprep.subr.bf16.mxu0 (!%p247_p2), %v2087_v1  ;;  %v2042_v8 = vld [vmem:[%s2482_s2 + $0x38] sm:$0xff] (!%p247_p2)   ;;  %v2218_v32 = vld [vmem:[%s2484_s4 + $0x20] sm:$0xff] (!%p247_p2)   ;;  %v2233_v34 = vld [vmem:[%s2484_s4 + $0x28] sm:$0xff] (!%p247_p2)  }
   0x9   : > { %1801 = vmatprep.subr.bf16.mxu1 (!%p247_p2), %v2087_v1  ;;  %1807 = vmatprep.mubr.msk.bf16.mxu1 (!%p247_p2), %vm2088_vm0, %v2087_v1  ;;  %v465_v13 = vadd.s32 (!%p247_p2), 1, %v458_v11  ;;  %v1583_v14 = vadd.s32 (!%p247_p2), 4294967295, %v458_v11  ;;  %v2051_v33 = vld [vmem:[%s2483_s3 + $0x40] sm:$0xff] (!%p247_p2)   ;;  %v2052_v35 = vld [vmem:[%s2483_s3 + $0x48] sm:$0xff] (!%p247_p2)   ;;  %v2249_v36 = vld [vmem:[%s2484_s4 + $0x30] sm:$0xff] (!%p247_p2)  }
   0xa   : > { %v2053_v37 = vld [vmem:[%s2483_s3 + $0x50] sm:$0xff] (!%p247_p2)   ;;  %v2260_v38 = vld [vmem:[%s2484_s4 + $0x38] sm:$0xff] (!%p247_p2)   ;;  %v2271_v40 = vld [vmem:[%s2484_s4 + $0x40] sm:$0xff] (!%p247_p2)  }
   0xb   : > { %1790 = vmatpush3.bf16.msra.mxu0 (!%p247_p2), %v2037_v3  ;;  %vm466_vm2 = vcmp.eq.s32.totalorder (!%p247_p2), %v460_v12, %v465_v13  ;;  %vm462_vm3 = vcmp.eq.s32.totalorder (!%p247_p2), %v460_v12, %v1583_v14  ;;  %v2054_v39 = vld [vmem:[%s2483_s3 + $0x58] sm:$0xff] (!%p247_p2)   ;;  %v2055_v41 = vld [vmem:[%s2483_s3 + $0x60] sm:$0xff] (!%p247_p2)   ;;  %v2284_v42 = vld [vmem:[%s2484_s4 + $0x48] sm:$0xff] (!%p247_p2)  }
   0xc   : > { %1802 = vmatpush3.bf16.msra.mxu1 (!%p247_p2), %v2038_v4  ;;  %1791 = vmatprep.subr.bf16.mxu0 (!%p247_p2), %v2087_v1  ;;  %v1585_v20 = vsel (!%p247_p2), %vm466_vm2, 1.0, %v2087_v1  ;;  %v1584_v24 = vsel (!%p247_p2), %vm462_vm3, 1.0, %v2087_v1  ;;  %v2056_v43 = vld [vmem:[%s2483_s3 + $0x68] sm:$0xff] (!%p247_p2)   ;;  %v2297_v44 = vld [vmem:[%s2484_s4 + $0x50] sm:$0xff] (!%p247_p2)   ;;  %v2308_v46 = vld [vmem:[%s2484_s4 + $0x58] sm:$0xff] (!%p247_p2)  }
   0xd   : > { %s2489_s25 = smov (!%p282_p3, %s1553_s25), 3  ;;  %1803 = vmatprep.subr.bf16.mxu1 %v2087_v1  ;;  %v2057_v45 = vld [vmem:[%s2483_s3 + $0x70] sm:$0xff]   ;;  %v2058_v47 = vld [vmem:[%s2483_s3 + $0x78] sm:$0xff]   ;;  %v2059_v48 = vld [vmem:[%s2483_s3] sm:$0xff]  }
   0xe   : > { %s1558_s13 = sshll.u32 %s2489_s25, 2  ;;  %s1683_s23 = sshll.u32 %s2489_s25, 3  ;;  %v2060_v49 = vld [vmem:[%s2483_s3 + $0x8] sm:$0xff]   ;;  %v2061_v50 = vld [vmem:[%s2483_s3 + $0x10] sm:$0xff]   ;;  %v2062_v51 = vld [vmem:[%s2483_s3 + $0x18] sm:$0xff]  }
   0xf   : > { %s285_s22 = scalar_lea.vmem %s2480_s0, %s1558_s13  ;;  %1792 = vmatpush3.bf16.msra.mxu0 %v2039_v5  ;;  %s290_s28 = scalar_lea.vmem %s2481_s1, %s1683_s23  ;;  %v2063_v52 = vld [vmem:[%s2483_s3 + $0x20] sm:$0xff]   ;;  %v2064_v53 = vld [vmem:[%s2483_s3 + $0x28] sm:$0xff]   ;;  %v2065_v54 = vld [vmem:[%s2483_s3 + $0x30] sm:$0xff]  }
  0x10   : > { %1804 = vmatpush3.bf16.msra.mxu1 %v2040_v6  ;;  %1793 = vmatprep.subr.bf16.mxu0 %v2087_v1  ;;  %v297_v9 = vld [vmem:[%s285_s22] sm:$0xf]  ;;  %v2202_v25 = vld [vmem:[%s290_s28 + $0x4] sm:$0xf]  ;;  %v2066_v55 = vld [vmem:[%s2483_s3 + $0x38] sm:$0xff]   ;;  %s1684_s19 = sshll.u32 %s2489_s25, 4 }
  0x11   : > { %1805 = vmatprep.subr.bf16.mxu1 %v2087_v1  ;;  %v2194_v17 = vld [vmem:[%s290_s28] sm:$0xf]  ;;  %v618_v31 = vsel %vm616_vm4, %v2202_v25, 0  ;;  %v2068_v57 = vld [vmem:[%s2483_s3 + $0x88] sm:$0xff]   ;;  %v2069_v58 = vld [vmem:[%s2483_s3 + $0x90] sm:$0xff]   ;;  %s295_s22 = scalar_lea.vmem %s2487_s7, %s1684_s19 }
  0x12   : > { %v659_v28 = vsel %vm616_vm4, %v2194_v17, 0  ;;  %v2067_v56 = vld [vmem:[%s2483_s3 + $0x80] sm:$0xff]   ;;  %v2070_v59 = vld [vmem:[%s2483_s3 + $0x98] sm:$0xff]   ;;  %v2072_v61 = vld [vmem:[%s2483_s3 + $0xa8] sm:$0xff]  }
  0x13   : > { %1794 = vmatpush3.bf16.msra.mxu0 %v2041_v7  ;;  %v2071_v60 = vld [vmem:[%s2483_s3 + $0xa0] sm:$0xff]   ;;  %v2073_v62 = vld [vmem:[%s2483_s3 + $0xb0] sm:$0xff]   ;;  %v2074_v63 = vld [vmem:[%s2483_s3 + $0xb8] sm:$0xff]  }
  0x14   : > { %1806 = vmatpush3.bf16.msra.mxu1 %v2042_v8  ;;  %1811 = vmatprep.subr.mxu0 %v2087_v1  ;;  %v2075_v13 = vld [vmem:[%s2484_s4] sm:$0xff]   ;;  %v2076_v14 = vld [vmem:[%s2484_s4 + $0x8] sm:$0xff]  }
  0x15   : > { %1816 = vmatprep.subr.mxu1 %v2087_v1 }
  0x16   : > { %1796 = vmatmul.mubr.msk.bf16.vlgmr.msra.gmra.mrb[0].mxu0 %vm340_vm1, %v297_v9 }
  0x17   : > { %1808 = vmatmul.mubr.msk.bf16.vlgmr.msra.gmra.mrb[0].mxu1 %vm340_vm1, %v297_v9  ;;  %1813 = vmatprep.mubr.msk.f32.mxu0 %vm2088_vm0, %v2087_v1 }
  0x18   : > { %1818 = vmatprep.mubr.msk.f32.mxu1 %vm2088_vm0, %v2087_v1 }
  0xe9   : > { %v378_v16 = vpop.f32.mrb[0].mxu0 }
  0xea   : > { %v2196_v18 = vadd.f32 %v1564_v15, %v378_v16  ;;  %v451_v19 = vpop.f32.mrb[0].mxu1  ;;  %v1797_v21 = vpop.f32.mrb[1].mxu0 }
  0xeb   : > { %v2199_v22 = vadd.f32 %v1564_v15, %v451_v19  ;;  %v1809_v23 = vpop.f32.mrb[1].mxu1  ;;  %v381_v26 = vpop.f32.mrb[2].mxu0  ;;  %v2078_v21 = vld [vmem:[%s2484_s4 + $0x18] sm:$0xff]  }
  0xec   : > { %v454_v27 = vpop.f32.mrb[2].mxu1  ;;  %1817 = vmatpush3.msra.mxu1 %v2196_v18  ;;  %v1798_v29 = vpop.f32.mrb[3].mxu0 }
  0xed   : > { %v1810_v30 = vpop.f32.mrb[3].mxu1  ;;  %1812 = vmatpush3.msra.mxu0 %v2199_v22  ;;  %1819 = vmatmul.mubr.msk.f32.vlgmr.msra.gmra.mrb[4].mxu1 %vm469_vm5, %v1585_v20  ;;  %v1677_v29 = vld [vmem:[%s2486_s6] ss:$0 sm:$0xff] }
  0xee   : > { %1814 = vmatmul.mubr.msk.f32.vlgmr.msra.gmra.mrb[4].mxu0 %vm469_vm5, %v1584_v24  ;;  %1826 = vmatprep.subr.bf16.mxu1 %v2087_v1 }
  0xef   : > { %1827 = vmatpush3.bf16.msra.mxu1 %v659_v28  ;;  %1828 = vmatprep.mubr.msk.f32.mxu1 %vm2088_vm0, %v2087_v1 }
  0xf0   : > { %1899 = vmatprep.subr.bf16.mxu1 %v2087_v1  ;;  %1821 = vmatprep.subr.bf16.mxu0 %v2087_v1 }
  0xf1   : > { %1822 = vmatpush3.bf16.msra.mxu0 %v618_v31  ;;  %1823 = vmatprep.mubr.msk.f32.mxu0 %vm2088_vm0, %v2087_v1 }
  0xf2   : > { %1829 = vmatmul.mubr.msk.f32.vlgmr.msra.gmra.mrb[6].mxu1 %vm469_vm5, %v1585_v20  ;;  %1831 = vmatprep.subr.bf16.mxu0 %v2087_v1 }
  0xf3   : > { %1900 = vmatpush3.bf16.msra.mxu1 %v2218_v32  ;;  %1907 = vmatprep.mubr.msk.bf16.mxu1 %vm2088_vm0, %v2087_v1 }
  0xf4   : > { %1901 = vmatprep.subr.bf16.mxu1 %v2087_v1  ;;  %1824 = vmatmul.mubr.msk.f32.vlgmr.msra.gmra.mrb[6].mxu0 %vm469_vm5, %v1584_v24 }
  0xf5   : > { %1832 = vmatpush3.bf16.msra.mxu0 %v2051_v33  ;;  %1847 = vmatprep.mubr.msk.f32.mxu0 %vm2088_vm0, %v2087_v1 }
  0xf6   : > { %1833 = vmatprep.subr.bf16.mxu0 %v2087_v1 }
  0xf7   : > { %1902 = vmatpush3.bf16.msra.mxu1 %v2233_v34 }
  0xf8   : > { %1903 = vmatprep.subr.bf16.mxu1 %v2087_v1 }
  0xf9   : > { %1834 = vmatpush3.bf16.msra.mxu0 %v2052_v35 }
  0xfa   : > { %1835 = vmatprep.subr.bf16.mxu0 %v2087_v1 }
  0xfb   : > { %1904 = vmatpush3.bf16.msra.mxu1 %v2249_v36 }
  0xfc   : > { %1905 = vmatprep.subr.bf16.mxu1 %v2087_v1 }
  0xfd   : > { %1836 = vmatpush3.bf16.msra.mxu0 %v2053_v37 }
  0xfe   : > { %1837 = vmatprep.subr.bf16.mxu0 %v2087_v1 }
  0xff   : > { %1906 = vmatpush3.bf16.msra.mxu1 %v2260_v38 }
 0x100   : > { %1911 = vmatprep.subr.bf16.mxu1 %v2087_v1 }
 0x101   : > { %1838 = vmatpush3.bf16.msra.mxu0 %v2054_v39 }
 0x102   : > { %1908 = vmatmul.mubr.msk.bf16.vlgmr.msra.gmra.mrb[8].mxu1 %vm340_vm1, %v2194_v17  ;;  %1839 = vmatprep.subr.bf16.mxu0 %v2087_v1 }
 0x103   : > { %1912 = vmatpush3.bf16.msra.mxu1 %v2271_v40  ;;  %1919 = vmatprep.mubr.msk.bf16.mxu1 %vm2088_vm0, %v2087_v1 }
 0x104   : > { %1913 = vmatprep.subr.bf16.mxu1 %v2087_v1 }
 0x105   : > { %1840 = vmatpush3.bf16.msra.mxu0 %v2055_v41 }
 0x106   : > { %1841 = vmatprep.subr.bf16.mxu0 %v2087_v1 }
 0x107   : > { %1914 = vmatpush3.bf16.msra.mxu1 %v2284_v42 }
 0x108   : > { %1915 = vmatprep.subr.bf16.mxu1 %v2087_v1 }
 0x109   : > { %1842 = vmatpush3.bf16.msra.mxu0 %v2056_v43 }
 0x10a   : > { %1843 = vmatprep.subr.bf16.mxu0 %v2087_v1 }
 0x10b   : > { %1916 = vmatpush3.bf16.msra.mxu1 %v2297_v44 }
 0x10c   : > { %1917 = vmatprep.subr.bf16.mxu1 %v2087_v1 }
 0x10d   : > { %1844 = vmatpush3.bf16.msra.mxu0 %v2057_v45 }
 0x10e   : > { %1845 = vmatprep.subr.bf16.mxu0 %v2087_v1 }
 0x10f   : > { %1918 = vmatpush3.bf16.msra.mxu1 %v2308_v46 }
 0x110   : > { %1923 = vmatprep.subr.bf16.mxu1 %v2087_v1 }
 0x111   : > { %1846 = vmatpush3.bf16.msra.mxu0 %v2058_v47 }
 0x112   : > { %1920 = vmatmul.mubr.msk.bf16.vlgmr.msra.gmra.mrb[12].mxu1 %vm340_vm1, %v2202_v25  ;;  %1850 = vmatprep.subr.bf16.mxu0 %v2087_v1 }
 0x113   : > { %1924 = vmatpush3.bf16.msra.mxu1 %v2051_v33  ;;  %1939 = vmatprep.mubr.msk.f32.mxu1 %vm2088_vm0, %v2087_v1 }
 0x114   : > { %1925 = vmatprep.subr.bf16.mxu1 %v2087_v1  ;;  %1848 = vmatmul.mubr.f32.vlgmr.msra.gmra.mrb[8].mxu0 %v2196_v18 }
 0x115   : > { %1851 = vmatpush3.bf16.msra.mxu0 %v2059_v48  ;;  %1866 = vmatprep.mubr.msk.f32.mxu0 %vm2088_vm0, %v2087_v1 }
 0x116   : > { %1852 = vmatprep.subr.bf16.mxu0 %v2087_v1 }
 0x117   : > { %1926 = vmatpush3.bf16.msra.mxu1 %v2052_v35 }
 0x118   : > { %1927 = vmatprep.subr.bf16.mxu1 %v2087_v1 }
 0x119   : > { %1853 = vmatpush3.bf16.msra.mxu0 %v2060_v49 }
 0x11a   : > { %1854 = vmatprep.subr.bf16.mxu0 %v2087_v1 }
 0x11b   : > { %1928 = vmatpush3.bf16.msra.mxu1 %v2053_v37 }
 0x11c   : > { %1929 = vmatprep.subr.bf16.mxu1 %v2087_v1 }
 0x11d   : > { %1855 = vmatpush3.bf16.msra.mxu0 %v2061_v50 }
 0x11e   : > { %1856 = vmatprep.subr.bf16.mxu0 %v2087_v1 }
 0x11f   : > { %1930 = vmatpush3.bf16.msra.mxu1 %v2054_v39 }
 0x120   : > { %1931 = vmatprep.subr.bf16.mxu1 %v2087_v1 }
 0x121   : > { %1857 = vmatpush3.bf16.msra.mxu0 %v2062_v51 }
 0x122   : > { %1858 = vmatprep.subr.bf16.mxu0 %v2087_v1 }
 0x123   : > { %1932 = vmatpush3.bf16.msra.mxu1 %v2055_v41 }
 0x124   : > { %1933 = vmatprep.subr.bf16.mxu1 %v2087_v1 }
 0x125   : > { %1859 = vmatpush3.bf16.msra.mxu0 %v2063_v52 }
 0x126   : > { %1860 = vmatprep.subr.bf16.mxu0 %v2087_v1 }
 0x127   : > { %1934 = vmatpush3.bf16.msra.mxu1 %v2056_v43 }
 0x128   : > { %1935 = vmatprep.subr.bf16.mxu1 %v2087_v1 }
 0x129   : > { %1861 = vmatpush3.bf16.msra.mxu0 %v2064_v53 }
 0x12a   : > { %1862 = vmatprep.subr.bf16.mxu0 %v2087_v1 }
 0x12b   : > { %1936 = vmatpush3.bf16.msra.mxu1 %v2057_v45 }
 0x12c   : > { %1937 = vmatprep.subr.bf16.mxu1 %v2087_v1 }
 0x12d   : > { %1863 = vmatpush3.bf16.msra.mxu0 %v2065_v54 }
 0x12e   : > { %1864 = vmatprep.subr.bf16.mxu0 %v2087_v1 }
 0x12f   : > { %1938 = vmatpush3.bf16.msra.mxu1 %v2058_v47 }
 0x130   : > { %1942 = vmatprep.subr.bf16.mxu1 %v2087_v1 }
 0x131   : > { %1865 = vmatpush3.bf16.msra.mxu0 %v2066_v55 }
 0x132   : > { %1940 = vmatmul.mubr.f32.vlgmr.msra.gmra.mrb[16].mxu1 %v2199_v22  ;;  %1869 = vmatprep.subr.bf16.mxu0 %v2087_v1 }
 0x133   : > { %1943 = vmatpush3.bf16.msra.mxu1 %v2059_v48  ;;  %1958 = vmatprep.mubr.msk.f32.mxu1 %vm2088_vm0, %v2087_v1 }
 0x134   : > { %1944 = vmatprep.subr.bf16.mxu1 %v2087_v1 }
 0x137   : > { %1945 = vmatpush3.bf16.msra.mxu1 %v2060_v49 }
 0x138   : > { %1946 = vmatprep.subr.bf16.mxu1 %v2087_v1 }
 0x13b   : > { %1947 = vmatpush3.bf16.msra.mxu1 %v2061_v50 }
 0x13c   : > { %1948 = vmatprep.subr.bf16.mxu1 %v2087_v1 }
 0x13f   : > { %1949 = vmatpush3.bf16.msra.mxu1 %v2062_v51 }
 0x140   : > { %1950 = vmatprep.subr.bf16.mxu1 %v2087_v1 }
 0x143   : > { %1951 = vmatpush3.bf16.msra.mxu1 %v2063_v52 }
 0x144   : > { %1952 = vmatprep.subr.bf16.mxu1 %v2087_v1 }
 0x147   : > { %1953 = vmatpush3.bf16.msra.mxu1 %v2064_v53 }
 0x148   : > { %1954 = vmatprep.subr.bf16.mxu1 %v2087_v1 }
 0x14b   : > { %1955 = vmatpush3.bf16.msra.mxu1 %v2065_v54 }
 0x14c   : > { %1956 = vmatprep.subr.bf16.mxu1 %v2087_v1 }
 0x14f   : > { %1957 = vmatpush3.bf16.msra.mxu1 %v2066_v55 }
 0x150   : > { %1961 = vmatprep.subr.bf16.mxu1 %v2087_v1 }
 0x152   : > { %1959 = vmatmul.mubr.f32.vlgmr.msra.gmra.mrb[16].mxu1 %v2196_v18  ;;  %v2077_v18 = vld [vmem:[%s2484_s4 + $0x10] sm:$0xff]  }
 0x153   : > { %1962 = vmatpush3.bf16.msra.mxu1 %v2067_v56  ;;  %1977 = vmatprep.mubr.msk.f32.mxu1 %vm2088_vm0, %v2087_v1 }
 0x154   : > { %1963 = vmatprep.subr.bf16.mxu1 %v2087_v1 }
 0x157   : > { %1964 = vmatpush3.bf16.msra.mxu1 %v2068_v57 }
 0x158   : > { %1965 = vmatprep.subr.bf16.mxu1 %v2087_v1 }
 0x15b   : > { %1966 = vmatpush3.bf16.msra.mxu1 %v2069_v58 }
 0x15c   : > { %1967 = vmatprep.subr.bf16.mxu1 %v2087_v1 }
 0x15f   : > { %1968 = vmatpush3.bf16.msra.mxu1 %v2070_v59 }
 0x160   : > { %1969 = vmatprep.subr.bf16.mxu1 %v2087_v1 }
 0x163   : > { %1970 = vmatpush3.bf16.msra.mxu1 %v2071_v60 }
 0x164   : > { %1971 = vmatprep.subr.bf16.mxu1 %v2087_v1 }
 0x167   : > { %1972 = vmatpush3.bf16.msra.mxu1 %v2072_v61 }
 0x168   : > { %1973 = vmatprep.subr.bf16.mxu1 %v2087_v1 }
 0x16b   : > { %1974 = vmatpush3.bf16.msra.mxu1 %v2073_v62 }
 0x16c   : > { %1975 = vmatprep.subr.bf16.mxu1 %v2087_v1 }
 0x16f   : > { %1976 = vmatpush3.bf16.msra.mxu1 %v2074_v63 }
 0x170   : > { %2004 = vmatprep.subr.bf16.mxu1 %v2087_v1 }
 0x1c0   : > { %v612_v0 = vpop.f32.mrb[4].mxu1 }
 0x1c1   : > { %v539_v2 = vpop.f32.mrb[4].mxu0  ;;  %1978 = vmatmul.mubr.f32.vlgmr.msra.gmra.mrb[16].mxu1 %v612_v0  ;;  %v1820_v3 = vpop.f32.mrb[5].mxu1 }
 0x1c2   : > { %1867 = vmatmul.mubr.f32.vlgmr.msra.gmra.mrb[8].mxu0 %v539_v2  ;;  %v1815_v4 = vpop.f32.mrb[5].mxu0  ;;  %2005 = vmatpush3.bf16.msra.mxu1 %v2271_v40 }
 0x1c3   : > { %1870 = vmatpush3.bf16.msra.mxu0 %v2067_v56  ;;  %1885 = vmatprep.mubr.msk.f32.mxu0 %vm2088_vm0, %v2087_v1 }
 0x1c4   : > { %1871 = vmatprep.subr.bf16.mxu0 %v2087_v1  ;;  %2006 = vmatprep.subr.bf16.mxu1 %v2087_v1 }
 0x1c5   : > { %v695_v5 = vpop.f32.mrb[6].mxu1  ;;  %2012 = vmatprep.mubr.msk.f32.mxu1 %vm2088_vm0, %v2087_v1 }
 0x1c6   : > { %2007 = vmatpush3.bf16.msra.mxu1 %v2284_v42  ;;  %v1830_v6 = vpop.f32.mrb[7].mxu1 }
 0x1c7   : > { %1872 = vmatpush3.bf16.msra.mxu0 %v2068_v57  ;;  %v654_v7 = vpop.f32.mrb[6].mxu0  ;;  %2008 = vmatprep.subr.bf16.mxu1 %v2087_v1 }
 0x1c8   : > { %1873 = vmatprep.subr.bf16.mxu0 %v2087_v1  ;;  %v1825_v8 = vpop.f32.mrb[7].mxu0 }
 0x1ca   : > { %2009 = vmatpush3.bf16.msra.mxu1 %v2297_v44 }
 0x1cb   : > { %1874 = vmatpush3.bf16.msra.mxu0 %v2069_v58  ;;  %2010 = vmatprep.subr.bf16.mxu1 %v2087_v1 }
 0x1cc   : > { %1875 = vmatprep.subr.bf16.mxu0 %v2087_v1 }
 0x1ce   : > { %2011 = vmatpush3.bf16.msra.mxu1 %v2308_v46 }
 0x1cf   : > { %1876 = vmatpush3.bf16.msra.mxu0 %v2070_v59 }
 0x1d0   : > { %1877 = vmatprep.subr.bf16.mxu0 %v2087_v1 }
 0x1d1   : > { %2013 = vmatmul.mubr.msk.f32.vlgmr.msra.gmra.mrb[18].mxu1 %vm340_vm1, %v695_v5 }
 0x1d3   : > { %1878 = vmatpush3.bf16.msra.mxu0 %v2071_v60 }
 0x1d4   : > { %1879 = vmatprep.subr.bf16.mxu0 %v2087_v1 }
 0x1d5   : > { %v1152_v9 = vpop.f32.mrb[8].mxu1 }
 0x1d6   : > { %v1909_v10 = vpop.f32.mrb[9].mxu1 }
 0x1d7   : > { %1880 = vmatpush3.bf16.msra.mxu0 %v2072_v61  ;;  %v1155_v11 = vpop.f32.mrb[10].mxu1 }
 0x1d8   : > { %1881 = vmatprep.subr.bf16.mxu0 %v2087_v1  ;;  %v1910_v12 = vpop.f32.mrb[11].mxu1 }
 0x1db   : > { %1882 = vmatpush3.bf16.msra.mxu0 %v2073_v62 }
 0x1dc   : > { %1883 = vmatprep.subr.bf16.mxu0 %v2087_v1 }
 0x1df   : > { %1884 = vmatpush3.bf16.msra.mxu0 %v2074_v63 }
 0x1e0   : > { %1888 = vmatprep.subr.bf16.mxu0 %v2087_v1 }
 0x1e2   : > { %1886 = vmatmul.mubr.f32.vlgmr.msra.gmra.mrb[8].mxu0 %v2199_v22 }
 0x1e3   : > { %1889 = vmatpush3.bf16.msra.mxu0 %v2075_v13  ;;  %1896 = vmatprep.mubr.msk.f32.mxu0 %vm2088_vm0, %v2087_v1 }
 0x1e4   : > { %1890 = vmatprep.subr.bf16.mxu0 %v2087_v1 }
 0x1e5   : > { %v1228_v15 = vpop.f32.mrb[12].mxu1 }
 0x1e6   : > { %v1921_v16 = vpop.f32.mrb[13].mxu1 }
 0x1e7   : > { %1891 = vmatpush3.bf16.msra.mxu0 %v2076_v14  ;;  %v1231_v19 = vpop.f32.mrb[14].mxu1 }
 0x1e8   : > { %1892 = vmatprep.subr.bf16.mxu0 %v2087_v1  ;;  %v1922_v20 = vpop.f32.mrb[15].mxu1 }
 0x1eb   : > { %1893 = vmatpush3.bf16.msra.mxu0 %v2077_v18 }
 0x1ec   : > { %1894 = vmatprep.subr.bf16.mxu0 %v2087_v1 }
 0x1ef   : > { %1895 = vmatpush3.bf16.msra.mxu0 %v2078_v21 }
 0x1f0   : > { %1980 = vmatprep.subr.bf16.mxu0 %v2087_v1 }
 0x1f2   : > { %1897 = vmatmul.mubr.msk.f32.vlgmr.msra.gmra.mrb[8].mxu0 %vm340_vm1, %v654_v7 }
 0x1f3   : > { %1981 = vmatpush3.bf16.msra.mxu0 %v2075_v13  ;;  %1988 = vmatprep.mubr.msk.bf16.mxu0 %vm2088_vm0, %v2087_v1 }
 0x1f4   : > { %1982 = vmatprep.subr.bf16.mxu0 %v2087_v1 }
 0x1f7   : > { %1983 = vmatpush3.bf16.msra.mxu0 %v2076_v14 }
 0x1f8   : > { %1984 = vmatprep.subr.bf16.mxu0 %v2087_v1 }
 0x1fb   : > { %1985 = vmatpush3.bf16.msra.mxu0 %v2077_v18 }
 0x1fc   : > { %1986 = vmatprep.subr.bf16.mxu0 %v2087_v1 }
 0x1ff   : > { %1987 = vmatpush3.bf16.msra.mxu0 %v2078_v21 }
 0x200   : > { %1992 = vmatprep.subr.bf16.mxu0 %v2087_v1 }
 0x202   : > { %1989 = vmatmul.mubr.msk.bf16.vlgmr.msra.gmra.mrb[12].mxu0 %vm340_vm1, %v2194_v17 }
 0x203   : > { %1993 = vmatpush3.bf16.msra.mxu0 %v2218_v32  ;;  %2000 = vmatprep.mubr.msk.bf16.mxu0 %vm2088_vm0, %v2087_v1 }
 0x204   : > { %1994 = vmatprep.subr.bf16.mxu0 %v2087_v1 }
 0x207   : > { %1995 = vmatpush3.bf16.msra.mxu0 %v2233_v34 }
 0x208   : > { %1996 = vmatprep.subr.bf16.mxu0 %v2087_v1 }
 0x20b   : > { %1997 = vmatpush3.bf16.msra.mxu0 %v2249_v36 }
 0x20c   : > { %1998 = vmatprep.subr.bf16.mxu0 %v2087_v1 }
 0x20f   : > { %1999 = vmatpush3.bf16.msra.mxu0 %v2260_v38 }
 0x212   : > { %2001 = vmatmul.mubr.msk.bf16.vlgmr.msra.gmra.mrb[16].mxu0 %vm340_vm1, %v2202_v25 }
 0x294   : > { %v1352_v17 = vpop.f32.mrb[16].mxu1 }
 0x295   : > { %v1979_v22 = vpop.f32.mrb[17].mxu1 }
 0x2a4   : > { %v1476_v23 = vpop.f32.mrb[18].mxu1 }
 0x2a5   : > { %v2014_v24 = vpop.f32.mrb[19].mxu1 }
 0x2c5   : > { %v1078_v26 = vpop.f32.mrb[8].mxu0 }
 0x2c6   : > { %v1158_v27 = vadd.f32 %v1152_v9, %v1078_v26  ;;  %v1898_v28 = vpop.f32.mrb[9].mxu0 }
 0x2c8   : > { %v1234_v30 = vadd.f32 %v1228_v15, %v1158_v27 }
 0x2ca   : > { %v1241_v31 = vadd.f32 %v1677_v29, %v1234_v30 }
 0x2cc   : > { %v1482_v1 = vmax.f32 %v1241_v31, 0.0 }
 0x2ce   : > { %1483 = vst [vmem:[%s295_s22] sm:$0xff] %v1482_v1 }
 0x2d5   : > { %v1391_v25 = vpop.f32.mrb[12].mxu0 }
 0x2d6   : > { %v1397_v32 = vadd.f32 %v1391_v25, %v1352_v17  ;;  %v1990_v33 = vpop.f32.mrb[13].mxu0 }
 0x2d7   : > { %v1394_v34 = vpop.f32.mrb[14].mxu0 }
 0x2d8   : > { %v1991_v35 = vpop.f32.mrb[15].mxu0 }
 0x2e5   : > { %v1432_v36 = vpop.f32.mrb[16].mxu0 }
 0x2e6   : > { %v1438_v37 = vadd.f32 %v1432_v36, %v1397_v32  ;;  %v2002_v38 = vpop.f32.mrb[17].mxu0 }
 0x2e7   : > { %v1435_v39 = vpop.f32.mrb[18].mxu0 }
 0x2e8   : > { %v1480_v40 = vadd.f32 %v1476_v23, %v1438_v37  ;;  %v2003_v41 = vpop.f32.mrb[19].mxu0 }
 0x2ea   : > { %v1481_v42 = vadd.f32 %v1677_v29, %v1480_v40 }
 0x2ec   : > { %v1484_v43 = vmax.f32 %v1481_v42, 0.0 }
 0x2ee   : > { %1485 = vst [vmem:[%s295_s22 + $0x8] sm:$0xff] %v1484_v43 }
 0x2ef PF: > { %s17_s24 = sadd.s32 1, %s2085_s24  }
 0x2f0   : > { %p14_p4 = scmp.ge.s32.totalorder %s17_s24, 6  }
 0x2f2   :  { %16 = sbr.rel (!%p14_p4) target bundleno = 1 (0x1), region = 87 }

</bundles_post_ra>
